<compile_context>
chip_gen: v6e
topology: v6e:2x2x1
jax: 0.10.0
libtpu: 0.0.40
codegen_flags: <defaults>
</compile_context>

<pallas_src>
import functools

import numpy as np
import jax
import jax.numpy as jnp
from jax import lax
from jax.experimental import pallas as pl
from jax.experimental.pallas import tpu as pltpu


_ROW_CHUNK = 32  # rows per inner iteration; keeps the whole chain vreg-resident


def _moving_norm_kernel(x_ref, o_ref, *, w, pad_l, lane_pad, fill_value):
    """Moving-window normalization (along the lane axis) of one (row_tile, W) block."""
    tr, W = x_ref.shape
    pad_r = w - pad_l - 1
    P = W + lane_pad                      # zero-extended lane width
    chunk = min(_ROW_CHUNK, tr)
    nchunks = tr // chunk                 # wrapper guarantees divisibility

    # Per-position window size (== the conv3d(ones) normalizer map), rebuilt
    # from a lane iota once per grid step: no extra input / DMA / resident VMEM.
    lane = lax.broadcasted_iota(jnp.int32, (1, W), 1)
    count = jnp.minimum(lane + pad_r, W - 1) - jnp.maximum(lane - pad_l, 0) + 1
    inv_count = 1.0 / count.astype(jnp.float32)           # (1, W), broadcasts

    zpad = jnp.zeros((chunk, lane_pad), jnp.float32)      # hoisted out of the loop

    def shift_fwd(v, s):
        # circular forward shift: out[..., j] = v[..., (j + s) % P]
        return v if s == 0 else pltpu.roll(v, P - s, axis=1)

    def box_sum(v):
        """Sum of v over each centred 'same' window via XLU shifted adds.

        v is zero-extended with lane_pad >= w - 1 zero lanes, so the circular
        rolls never wrap real data back into any window: no edge masks needed,
        and a NaN only touches the windows that actually contain it.  The
        width-w running sum is built with ~log2(w) roll+add doubling steps
        (binary decomposition of w) instead of an MXU band matmul.
        """
        vp = jnp.concatenate([v, zpad], axis=-1)          # (chunk, P), lane-aligned
        acc = None
        cur, offset, width, rem = vp, 0, 1, w
        while rem:
            if rem & 1:
                term = shift_fwd(cur, offset)
                acc = term if acc is None else acc + term
                offset += width
            rem >>= 1
            if rem:
                cur = cur + shift_fwd(cur, width)
                width *= 2
        if pad_l:
            acc = pltpu.roll(acc, pad_l, axis=1)          # out[i] = run_sum[i - pad_l]
        return acc[:, :W]

    def body(c, carry):
        r0 = pl.multiple_of(c * chunk, chunk)
        x = x_ref[pl.ds(r0, chunk), :].astype(jnp.float32)    # (chunk, W)
        mean = box_sum(x) * inv_count
        mean2 = box_sum(x * x) * inv_count
        var = jnp.maximum(mean2 - mean * mean, jnp.float32(1e-10))
        res = (x - mean) * lax.rsqrt(var)                 # rsqrt -> EUP slot
        res = jnp.nan_to_num(res, nan=fill_value)         # torch.nan_to_num semantics
        o_ref[pl.ds(r0, chunk), :] = res.astype(o_ref.dtype)
        return carry

    lax.fori_loop(0, nchunks, body, 0)


def moving_normalization(x, window=(1, 1, 100), padding='same', fill_value=0,
                         row_tile=2048):
    """JAX wrapper matching MovingNormalizationLayer.forward."""
    assert padding == 'same', "only padding='same' implemented"
    # TODO(synk): windows spanning the D/H axes (window[0] or window[1] > 1) and
    # the padding='valid' crop path are not implemented; the window only slides
    # along the last axis here.
    assert window[0] == 1 and window[1] == 1

    w = int(window[-1])
    pad_l = w // 2

    orig_shape = x.shape
    W = int(orig_shape[-1])
    rows = int(np.prod(orig_shape[:-1]))
    x2d = x.reshape(rows, W)              # collapsing leading dims: no data movement

    # Zero lanes appended inside the kernel; >= w - 1 of them absorb every
    # circular roll wrap (rounded to a lane-group multiple of 128 so the
    # in-kernel concat / prefix slice stay lane-aligned for W % 128 == 0).
    lane_pad = -(-max(w - 1, 1) // 128) * 128
    assert lane_pad >= w - 1

    # Row tiling: big tiles amortize the ~0.35 us per-grid-step overhead, but
    # cap so the grid keeps >= 2 steps (v7x shards the "parallel" axis across
    # its 2 TensorCores).  Must be a multiple of the in-kernel row chunk; the
    # trailing partial block is masked by Pallas (no host pad / slice needed).
    row_tile = max(_ROW_CHUNK, min(int(row_tile), pl.cdiv(rows, 2)))
    row_tile = -(-row_tile // _ROW_CHUNK) * _ROW_CHUNK
    grid = pl.cdiv(rows, row_tile)

    kernel = functools.partial(_moving_norm_kernel, w=w, pad_l=pad_l,
                               lane_pad=lane_pad, fill_value=float(fill_value))

    out2d = pl.pallas_call(
        kernel,
        out_shape=jax.ShapeDtypeStruct((rows, W), x.dtype),
        grid_spec=pltpu.PrefetchScalarGridSpec(
            num_scalar_prefetch=0,
            grid=(grid,),
            in_specs=[pl.BlockSpec((row_tile, W), lambda i: (i, 0))],
            out_specs=pl.BlockSpec((row_tile, W), lambda i: (i, 0)),
        ),
        compiler_params=pltpu.CompilerParams(
            dimension_semantics=("parallel",),
            vmem_limit_bytes=48 * 1024 * 1024,  # headroom for tile sweeps, < v7x's 64 MiB
        ),
    )(x2d)

    return out2d.reshape(orig_shape)


def _reference_numpy(x, window, fill_value):
    """Independent numpy reference of the PyTorch forward (window=(1,1,w), 'same')."""
    w = window[2]
    pad_l = w // 2
    pad_r = w - w // 2 - 1
    xn = np.asarray(x, dtype=np.float64)
    W = xn.shape[-1]
    flat = xn.reshape(-1, W)
    out = np.empty_like(flat)
    for i in range(W):
        lo = max(0, i - pad_l)
        hi = min(W, i + pad_r + 1)
        seg = flat[:, lo:hi]
        cnt = hi - lo
        mean = seg.sum(axis=-1) / cnt
        mean2 = (seg * seg).sum(axis=-1) / cnt
        std = np.sqrt(np.clip(mean2 - mean * mean, 1e-10, None))
        r = (flat[:, i] - mean) / std
        r = np.where(np.isnan(r), fill_value, r)
        out[:, i] = r
    return out.reshape(xn.shape).astype(np.float32)


if __name__ == "__main__":
    key = jax.random.PRNGKey(0)
    # (N, D, H, W): W = 128 keeps the lane axis dense; rows = 2*8*64 = 1024
    # gives a 2-step grid (row_tile is capped at rows // 2 = 512 here).
    x = jax.random.normal(key, (2, 8, 64, 128), dtype=jnp.float32)
    # One NaN to check per-window NaN -> fill_value semantics (a NaN must only
    # affect the windows that contain it, like F.conv3d with an ones kernel).
    x = x.at[0, 0, 0, 5].set(jnp.nan)

    for window in ((1, 1, 8), (1, 1, 100)):
        out = moving_normalization(x, window=window, padding='same', fill_value=0)
        out = jax.block_until_ready(out)
        ref = _reference_numpy(np.asarray(x), window, fill_value=0)
        np.testing.assert_allclose(np.asarray(out), ref, rtol=5e-4, atol=5e-4)

    print("KERNEL_OK")
</pallas_src>

<mosaic_0001>
module attributes {stable_mosaic.version = 11 : i64} {
  func.func @_moving_norm_kernel(%arg0: i32, %arg1: memref<512x128xf32, #tpu.memory_space<vmem>>, %arg2: memref<512x128xf32, #tpu.memory_space<vmem>>) attributes {dimension_semantics = [#tpu.dimension_semantics<parallel>], iteration_bounds = array<i64: 2>, scalar_prefetch = 0 : i64, scratch_operands = 0 : i64, tpu.core_type = #tpu.core_type<tc>, window_params = [{transform_indices = @transform_0, window_bounds = array<i64: 512, 128>}, {transform_indices = @transform_1, window_bounds = array<i64: 512, 128>}]} {
    %0 = tpu.iota {dimensions = array<i32: 1>} : vector<1x128xi32>
    %c3_i32 = arith.constant 3 : i32
    %1 = vector.broadcast %c3_i32 : i32 to vector<1x128xi32>
    %2 = arith.addi %0, %1 : vector<1x128xi32>
    %c127_i32 = arith.constant 127 : i32
    %3 = vector.broadcast %c127_i32 : i32 to vector<1x128xi32>
    %4 = arith.minsi %2, %3 : vector<1x128xi32>
    %c4_i32 = arith.constant 4 : i32
    %5 = vector.broadcast %c4_i32 : i32 to vector<1x128xi32>
    %6 = arith.subi %0, %5 : vector<1x128xi32>
    %c0_i32 = arith.constant 0 : i32
    %7 = vector.broadcast %c0_i32 : i32 to vector<1x128xi32>
    %8 = arith.maxsi %6, %7 : vector<1x128xi32>
    %9 = arith.subi %4, %8 : vector<1x128xi32>
    %c1_i32 = arith.constant 1 : i32
    %10 = vector.broadcast %c1_i32 : i32 to vector<1x128xi32>
    %11 = arith.addi %9, %10 : vector<1x128xi32>
    %12 = arith.sitofp %11 : vector<1x128xi32> to vector<1x128xf32>
    %cst = arith.constant 1.000000e+00 : f32
    %13 = vector.broadcast %cst : f32 to vector<1x128xf32>
    %14 = arith.divf %13, %12 : vector<1x128xf32>
    %cst_0 = arith.constant 0.000000e+00 : f32
    %15 = vector.broadcast %cst_0 : f32 to vector<32x128xf32>
    %c0_i32_1 = arith.constant 0 : i32
    %c16_i32 = arith.constant 16 : i32
    %16 = arith.addi %c0_i32_1, %c16_i32 : i32
    %c1_i32_2 = arith.constant 1 : i32
    scf.for %arg3 = %c0_i32_1 to %16 step %c1_i32_2  : i32 {
      %c32_i32 = arith.constant 32 : i32
      %17 = arith.muli %arg3, %c32_i32 : i32
      %18 = tpu.assume_multiple %17, 32 : i32
      %19 = arith.index_cast %18 : i32 to index
      %c0 = arith.constant 0 : index
      %20 = vector.load %arg1[%19, %c0] : memref<512x128xf32, #tpu.memory_space<vmem>>, vector<32x128xf32>
      %21 = tpu.concatenate %20, %15 in 1 : vector<32x128xf32>, vector<32x128xf32> -> vector<32x256xf32>
      %c255_i32 = arith.constant 255 : i32
      %22 = tpu.dynamic_rotate %21 by %c255_i32 dim 1 : vector<32x256xf32>, i32 -> vector<32x256xf32>
      %23 = arith.addf %21, %22 : vector<32x256xf32>
      %c254_i32 = arith.constant 254 : i32
      %24 = tpu.dynamic_rotate %23 by %c254_i32 dim 1 : vector<32x256xf32>, i32 -> vector<32x256xf32>
      %25 = arith.addf %23, %24 : vector<32x256xf32>
      %c252_i32 = arith.constant 252 : i32
      %26 = tpu.dynamic_rotate %25 by %c252_i32 dim 1 : vector<32x256xf32>, i32 -> vector<32x256xf32>
      %27 = arith.addf %25, %26 : vector<32x256xf32>
      %c4_i32_4 = arith.constant 4 : i32
      %28 = tpu.dynamic_rotate %27 by %c4_i32_4 dim 1 : vector<32x256xf32>, i32 -> vector<32x256xf32>
      %29 = vector.extract_strided_slice %28 {offsets = [0, 0], sizes = [32, 128], strides = [1, 1]} : vector<32x256xf32> to vector<32x128xf32>
      %30 = vector.broadcast %14 : vector<1x128xf32> to vector<32x128xf32>
      %31 = arith.mulf %29, %30 : vector<32x128xf32>
      %32 = arith.mulf %20, %20 : vector<32x128xf32>
      %33 = tpu.concatenate %32, %15 in 1 : vector<32x128xf32>, vector<32x128xf32> -> vector<32x256xf32>
      %c255_i32_5 = arith.constant 255 : i32
      %34 = tpu.dynamic_rotate %33 by %c255_i32_5 dim 1 : vector<32x256xf32>, i32 -> vector<32x256xf32>
      %35 = arith.addf %33, %34 : vector<32x256xf32>
      %c254_i32_6 = arith.constant 254 : i32
      %36 = tpu.dynamic_rotate %35 by %c254_i32_6 dim 1 : vector<32x256xf32>, i32 -> vector<32x256xf32>
      %37 = arith.addf %35, %36 : vector<32x256xf32>
      %c252_i32_7 = arith.constant 252 : i32
      %38 = tpu.dynamic_rotate %37 by %c252_i32_7 dim 1 : vector<32x256xf32>, i32 -> vector<32x256xf32>
      %39 = arith.addf %37, %38 : vector<32x256xf32>
      %c4_i32_8 = arith.constant 4 : i32
      %40 = tpu.dynamic_rotate %39 by %c4_i32_8 dim 1 : vector<32x256xf32>, i32 -> vector<32x256xf32>
      %41 = vector.extract_strided_slice %40 {offsets = [0, 0], sizes = [32, 128], strides = [1, 1]} : vector<32x256xf32> to vector<32x128xf32>
      %42 = vector.broadcast %14 : vector<1x128xf32> to vector<32x128xf32>
      %43 = arith.mulf %41, %42 : vector<32x128xf32>
      %44 = arith.mulf %31, %31 : vector<32x128xf32>
      %45 = arith.subf %43, %44 : vector<32x128xf32>
      %cst_9 = arith.constant 1.000000e-10 : f32
      %46 = vector.broadcast %cst_9 : f32 to vector<32x128xf32>
      %47 = arith.maximumf %45, %46 : vector<32x128xf32>
      %48 = arith.subf %20, %31 : vector<32x128xf32>
      %49 = math.rsqrt %47 : vector<32x128xf32>
      %50 = arith.mulf %48, %49 : vector<32x128xf32>
      %cst_10 = arith.constant 0.000000e+00 : f32
      %51 = arith.cmpf one, %50, %50 : vector<32x128xf32>
      %52 = vector.broadcast %cst_10 : f32 to vector<32x128xf32>
      %53 = arith.select %51, %52, %50 : vector<32x128xi1>, vector<32x128xf32>
      %cst_11 = arith.constant 0x7F800000 : f32
      %54 = vector.broadcast %cst_11 : f32 to vector<32x128xf32>
      %55 = arith.cmpf oeq, %53, %54 : vector<32x128xf32>
      %cst_12 = arith.constant 3.40282347E+38 : f32
      %56 = vector.broadcast %cst_12 : f32 to vector<32x128xf32>
      %57 = arith.select %55, %56, %53 : vector<32x128xi1>, vector<32x128xf32>
      %cst_13 = arith.constant 0xFF800000 : f32
      %58 = vector.broadcast %cst_13 : f32 to vector<32x128xf32>
      %59 = arith.cmpf oeq, %57, %58 : vector<32x128xf32>
      %cst_14 = arith.constant -3.40282347E+38 : f32
      %60 = vector.broadcast %cst_14 : f32 to vector<32x128xf32>
      %61 = arith.select %59, %60, %57 : vector<32x128xi1>, vector<32x128xf32>
      %62 = arith.index_cast %18 : i32 to index
      %c0_15 = arith.constant 0 : index
      %63 = vector.load %arg2[%62, %c0_15] : memref<512x128xf32, #tpu.memory_space<vmem>>, vector<32x128xf32>
      tpu.vector_store %arg2[%62, %c0_15], %61 {strides = array<i32>} : memref<512x128xf32, #tpu.memory_space<vmem>>, vector<32x128xf32>,
    }
    %c16_i32_3 = arith.constant 16 : i32
    return
  }
  func.func @transform_0(%arg0: i32) -> (i32, i32) {
    %c0_i32 = arith.constant 0 : i32
    %c0_i32_0 = arith.constant 0 : i32
    return %arg0, %c0_i32 : i32, i32
  }
  func.func @transform_1(%arg0: i32) -> (i32, i32) {
    %c0_i32 = arith.constant 0 : i32
    %c0_i32_0 = arith.constant 0 : i32
    return %arg0, %c0_i32 : i32, i32
  }
}

</mosaic_0001>

<bundles_post_ra>
// kernel: tpu_custom_call.1
= control target key start
LH: loop header
LB: loop body
LE: loop exit
PB: predicated region body
PF: predicated region fallthrough
CT: control target
= control target key end

     0   :  { %6 = vsyncpa [#allocation3], 0  ;;  %s1235_s0 = inlined_call_operand.hbm [shape: f32[1024,128], index: 0, kind: input, shape index: {}]   ;;  %s1236_s1 = inlined_call_operand.hbm [shape: f32[1024,128], index: 1, kind: output, shape index: {}]  }
   0x1   :  { %8 = vsyncpa [#allocation3 + $0x1], 0 }
   0x2   :  { %9 = vsyncpa [#allocation4], 0 }
   0x3   :  { %11 = vsyncpa [#allocation4 + $0x1], 0  ;;  %s759_s6 = smov 0   ;;  %s761_s7 = smov 0  }
   0x4   :  { %s763_s8 = smov 0   ;;  %s765_s9 = smov 0  }
   0x5 LB: > { %s780_s10 = sadd.s32 4294967295, %s732_s9   ;;  %s545_s11 = sadd.s32 4294967294, %s732_s9   ;;  %s732_s9 = sphi %s765_s9, %s1251_s9   ;;  %s728_s8 = sphi %s763_s8, %s1250_s8   ;;  %s724_s7 = sphi %s761_s7, %s1249_s7   ;;  %s720_s6 = sphi %s759_s6, %s1248_s6  }
   0x6   : > { %s784_s12 = sadd.s32 1, %s732_s9   ;;  %s24_s13 = sadd.s32 1, %s728_s8 }
   0x7   : > { %s21_s14 = ssub.s32 %s732_s9, %s784_s12  ;;  %p31_p0 = scmp.ne.s32.totalorder %s728_s8, %s724_s7 }
   0x8   : > { %p22_p1 = scmp.eq.s32.totalorder %s21_s14, 0  ;;  %p32_p2 = scmp.eq.s32.totalorder %s732_s9, 0 }
   0x9   : > { %p37_p3 = scmp.ne.s32.totalorder %s724_s7, %s720_s6  ;;  %p38_p4 = scmp.eq.s32.totalorder %s780_s10, 0 }
   0xa   : > { %s796_s15 = scalar_select %p22_p1, %s728_s8, %s24_s13  }
   0xb   : > { %p798_p5 = por %p32_p2, %p31_p0  ;;  %p802_p6 = por %p38_p4, %p37_p3 }
   0xc   : > { %p61_p7 = scmp.eq.s32.totalorder %s780_s10, 1  ;;  %p67_p8 = scmp.eq.s32.totalorder %s545_s11, 1 }
   0xd   : > { %s1240_s17 = scalar_select %p802_p6, 1, 0 }
   0xe   : > { %p575_p10 = scmp.lt.s32.totalorder %s732_s9, 2  ;;  %p809_p11 = por %p61_p7, %p31_p0 }
   0xf   : > { %p813_p12 = por %p67_p8, %p37_p3  ;;  %s87_s20 = sand.u32 1, %s728_s8  }
  0x10   : > { %s1241_s18 = scalar_select %p809_p11, 1, 0 }
  0x11   : > { %s1242_s19 = scalar_select %p813_p12, 1, 0 }
  0x12   : > { %s561_s21 = sshll.u32 %s732_s9, 13  ;;  %s548_s22 = sshll.u32 %s87_s20, 9 }
  0x13   : > { %s822_s25 = scalar_lea.hbm %s1235_s0, %s561_s21  ;;  %s91_s26 = scalar_lea.vmem [#allocation2], %s548_s22 }
  0x14   : > { %s98_s27 = sshll.u32 %s91_s26, 4  ;;  %p826_p13 = pnand %p575_p10, %p798_p5  ;;  %s830_s27 = int_to_ptr.vmem [resolvable:$true] %s98_s27 }
  0x15   : > { %s832_s29 = scalar_lea.sflag [#allocation3], %s87_s20  ;;  %s636_s30 = scalar_lea.hbm %s822_s25, 8192 }
  0x16   : > { %p637_p0 = scmp.ne.s32.totalorder %s822_s25, %s636_s30  ;;  %p638_p1 = pneg %p826_p13 }
  0x17   : > { %s641_s4 = scalar_lea.hbm %s1235_s0, 16384  ;;  %p642_p4 = scmp.lt.s32.totalorder %s822_s25, %s1235_s0 }
  0x18   : > { %p639_p2 = pnand %p638_p1, %p637_p0  ;;  %p643_p5 = scmp.lt.s32.totalorder %s641_s4, %s636_s30 }
  0x1a   : > { %p640_p3 = pneg %p639_p2  ;;  %p644_p7 = por %p643_p5, %p642_p4 }
  0x1c   : > { %p645_p8 = pnand %p644_p7, %p640_p3 }
  0x1e   : > { %648 = shalt.err (!%p645_p8)
}
  0x1f   : > { %s649_s13 = scalar_lea.vmem %s830_s27, 8192  ;;  %s738_s14 = smov [#allocation2]  }
  0x20   : > { %p650_p10 = scmp.ne.s32.totalorder %s830_s27, %s649_s13  ;;  %s654_s16 = sshll.u32 %s738_s14, 4  ;;  %s655_s16 = int_to_ptr.vmem [resolvable:$false] %s654_s16 }
  0x21   : > { %s656_s20 = scalar_lea.vmem %s655_s16, 16384  ;;  %p657_p2 = scmp.lt.s32.totalorder %s830_s27, %s655_s16 }
  0x22   : > { %p652_p9 = pnand %p650_p10, %p638_p1  ;;  %p658_p12 = scmp.lt.s32.totalorder %s656_s20, %s649_s13 }
  0x24   : > { %p653_p0 = pneg %p652_p9  ;;  %p659_p11 = por %p658_p12, %p657_p2 }
  0x26   : > { %p660_p6 = pnand %p659_p11, %p653_p0 }
  0x28   : > { %663 = shalt.err (!%p660_p6)
}
  0x29   : > { %s739_s21 = smov 128   ;;  %s740_s22 = smov 8  }
  0x2a   : > { %570 = dma.hbm_to_vmem [thread:$0]  (!%p826_p13), %s822_s25, 8192, %s830_s27, %s832_s29, %s739_s21, %s739_s21, %s740_s22  }
  0x2b   : > { %p551_p9 = scmp.ge.s32.totalorder %s732_s9, 1  ;;  %p106_p1 = scmp.lt.s32.totalorder %s732_s9, 3 }
  0x2d   : > { %p107_p3 = pnand %p551_p9, %p106_p1 }
  0x2e   : > { %s856_s23 = sand.u32 (!%p107_p3), 1, %s724_s7   ;;  %p1244_p6 = scmp.ne.s32.totalorder (!%p107_p3), %s1240_s17, 0 }
  0x2f   : > { %110 = sbr.rel (%p107_p3) target bundleno = 647 (0x287), region = 24  ;;  %s552_s24 = sshll.u32 (!%p107_p3), %s856_s23, 9 }
  0x30   : > { %s113_s26 = scalar_lea.sflag (!%p107_p3), [#allocation3], %s856_s23  ;;  %s860_s30 = scalar_lea.vmem (!%p107_p3), [#allocation2], %s552_s24 }
  0x34   : > { %711 = dma.done.wait (%p1244_p6), %s113_s26, 8192  }
  0x35   : > { %713 = vsyncadd (%p1244_p6), %s113_s26, 4294959104  ;;  %v137_v0 = vlaneseq  ;;  %s872_s25 = scalar_lea.vmem [#allocation5], %s552_s24  ;;  %s874_s17 = smov 0  }
  0x37   : > { %v866_v1 = vand.u32 127, %v137_v0 }
  0x39   : > { %v139_v2 = vadd.s32 3, %v866_v1  ;;  %v554_v3 = vadd.s32 4294967292, %v866_v1 }
  0x3b   : > { %vm140_vm0 = vcmp.lt.s32.totalorder %v139_v2, 127  ;;  %vm143_vm1 = vcmp.gt.s32.totalorder %v554_v3, 0 }
  0x3c   : > { %v141_v4 = vsel %vm140_vm0, %v139_v2, 127  ;;  %v144_v5 = vsel %vm143_vm1, %v554_v3, 0 }
  0x3d   : > { %v145_v6 = vsub.s32 %v141_v4, %v144_v5 }
  0x3f   : > { %v146_v7 = vadd.s32 1, %v145_v6 }
  0x41   : > { %v147_v8 = vcvt.s32.f32 %v146_v7 }
  0x43   : > { %626 = vrcp.f32 %v147_v8 }
  0x50   : > { %v870_v9 = vpop.eup %626 }
  0x51 LB: >> { %s555_s27 = sshll.u32 %s736_s17, 5  ;;  %s741_s29 = smov 127   ;;  %v742_v15 = vmov 0.0   ;;  %vm172_vm2 = vcmp.lt.s32.totalorder %v866_v1, 127  ;;  %vm205_vm3 = vcmp.lt.s32.totalorder %v866_v1, 126  ;;  %vm238_vm4 = vcmp.lt.s32.totalorder %v866_v1, 124  ;;  %s736_s17 = sphi %s874_s17, %s155_s17  }
  0x52   : >> { %s157_s28 = scalar_lea.vmem %s860_s30, %s555_s27 [#allocation2]  ;;  %s743_s2 = smov 126   ;;  %vm271_vm5 = vcmp.lt.s32.totalorder %v866_v1, 4 }
  0x53   : >> { %v883_v10 = vld [vmem:[%s157_s28 + $0x10] sm:$0xff]  ;;  %v885_v11 = vld [vmem:[%s157_s28] sm:$0xff]  ;;  %v889_v12 = vld [vmem:[%s157_s28 + $0x18] sm:$0xff]  ;;  %s744_s3 = smov 124   ;;  %s745_s4 = smov 4  }
  0x54   : >> { %166 = vrot.lane.b32.xlu1 %v883_v10, %s741_s29  ;;  %162 = vrot.lane.b32.xlu0 %v885_v11, %s741_s29  ;;  %v891_v13 = vld [vmem:[%s157_s28 + $0x8] sm:$0xff]  ;;  %v280_v14 = vmul.f32 %v885_v11, %v885_v11  ;;  %v282_v17 = vmul.f32 %v883_v10, %v883_v10  ;;  %v283_v18 = vmul.f32 %v889_v12, %v889_v12  ;;  %s444_s5 = scalar_lea.vmem %s872_s25, %s555_s27 [#allocation5]  ;;  %s155_s17 = sadd.s32 1, %s736_s17  }
  0x55   : >> { %v281_v16 = vmul.f32 %v891_v13, %v891_v13  ;;  %p152_p11 = scmp.ge.s32.totalorder %s155_s17, 16  }
  0x56   : > { %s562_s11 = sshll.u32 (%p152_p11), %s780_s10, 13  ;;  %s463_s20 = sshll.u32 (%p152_p11), %s872_s25, 4  ;;  %s1192_s20 = int_to_ptr.vmem [resolvable:$true] %s463_s20 }
  0x57   : > { %s1189_s16 = scalar_lea.hbm (%p152_p11), %s1236_s1, %s562_s11  ;;  %s450_s21 = scalar_lea.sflag (%p152_p11), [#allocation4], %s856_s23 }
  0x58   : >> { %168 = vrot.lane.b32.xlu1 %v889_v12, %s741_s29  ;;  %164 = vrot.lane.b32.xlu0 %v891_v13, %s741_s29  ;;  %s664_s22 = scalar_lea.vmem (%p152_p11), %s1192_s20, 8192  ;;  %p1245_p13 = scmp.ne.s32.totalorder (%p152_p11), %s1241_s18, 0 }
  0x59   : > { %p665_p12 = scmp.ne.s32.totalorder (%p152_p11), %s1192_s20, %s664_s22  ;;  %s746_s24 = smov (%p152_p11), [#allocation5]  }
  0x5a   : > { %s668_s26 = sshll.u32 (%p152_p11), %s746_s24, 4  ;;  %s669_s26 = int_to_ptr.vmem [resolvable:$false] %s668_s26 }
  0x5b   : > { %p666_p4 = pnand (%p152_p11), %p665_p12, %p1245_p13  ;;  %s670_s10 = scalar_lea.vmem (%p152_p11), %s669_s26, 16384 }
  0x5c   : >> { %170 = vrot.lane.b32.xlu0 %v742_v15, %s741_s29  ;;  %284 = vrot.lane.b32.xlu1 %v280_v14, %s741_s29  ;;  %p671_p7 = scmp.lt.s32.totalorder (%p152_p11), %s1192_s20, %s669_s26  ;;  %p672_p8 = scmp.lt.s32.totalorder (%p152_p11), %s670_s10, %s664_s22 }
  0x5d   : > { %p667_p5 = pneg (%p152_p11), %p666_p4 }
  0x5e   : > { %p673_p10 = por (%p152_p11), %p672_p8, %p671_p7 }
  0x60   : >> { %286 = vrot.lane.b32.xlu0 %v281_v16, %s741_s29  ;;  %288 = vrot.lane.b32.xlu1 %v282_v17, %s741_s29  ;;  %p674_p0 = pnand (%p152_p11), %p673_p10, %p667_p5 }
  0x64   : >> { %290 = vrot.lane.b32.xlu0 %v283_v18, %s741_s29 }
  0xc6   : >> { %v163_v19 = vpop.permute.xlu0 %162  ;;  %v167_v21 = vpop.permute.xlu1 %166 }
  0xca   : >> { %v165_v20 = vpop.permute.xlu0 %164  ;;  %v169_v25 = vpop.permute.xlu1 %168 }
  0xce   : >> { %v171_v22 = vpop.permute.xlu0 %170  ;;  %v285_v34 = vpop.permute.xlu1 %284 }
  0xcf   : >> { %v906_v23 = vsel %vm172_vm2, %v171_v22, %v165_v20  ;;  %v910_v24 = vsel %vm172_vm2, %v171_v22, %v163_v19  ;;  %v918_v26 = vsel %vm172_vm2, %v171_v22, %v169_v25  ;;  %v922_v27 = vsel %vm172_vm2, %v171_v22, %v167_v21 }
  0xd0   : >> { %199 = vrot.lane.b32.xlu0 %v906_v23, %s743_s2  ;;  %197 = vrot.lane.b32.xlu1 %v910_v24, %s743_s2  ;;  %v174_v28 = vsel %vm172_vm2, %v165_v20, %v171_v22  ;;  %v173_v29 = vsel %vm172_vm2, %v163_v19, %v171_v22  ;;  %v176_v32 = vsel %vm172_vm2, %v169_v25, %v171_v22 }
  0xd1   : >> { %v183_v30 = vadd.f32 %v174_v28, %v891_v13  ;;  %v181_v31 = vadd.f32 %v173_v29, %v885_v11  ;;  %v175_v33 = vsel %vm172_vm2, %v167_v21, %v171_v22  ;;  %v187_v36 = vadd.f32 %v176_v32, %v889_v12 }
  0xd2   : >> { %v287_v35 = vpop.permute.xlu0 %286  ;;  %v185_v37 = vadd.f32 %v175_v33, %v883_v10  ;;  %v292_v38 = vsel %vm172_vm2, %v285_v34, %v171_v22  ;;  %v954_v41 = vsel %vm172_vm2, %v171_v22, %v285_v34  ;;  %v289_v42 = vpop.permute.xlu1 %288 }
  0xd3   : >> { %v293_v39 = vsel %vm172_vm2, %v287_v35, %v171_v22  ;;  %v950_v40 = vsel %vm172_vm2, %v171_v22, %v287_v35  ;;  %v300_v44 = vadd.f32 %v292_v38, %v280_v14  ;;  %v294_v46 = vsel %vm172_vm2, %v289_v42, %v171_v22 }
  0xd4   : >> { %203 = vrot.lane.b32.xlu0 %v918_v26, %s743_s2  ;;  %201 = vrot.lane.b32.xlu1 %v922_v27, %s743_s2  ;;  %v302_v45 = vadd.f32 %v293_v39, %v281_v16  ;;  %v304_v48 = vadd.f32 %v294_v46, %v282_v17  ;;  %v974_v51 = vsel %vm172_vm2, %v171_v22, %v289_v42 }
  0xd6   : >> { %v291_v43 = vpop.permute.xlu0 %290 }
  0xd7   : >> { %v295_v47 = vsel %vm172_vm2, %v291_v43, %v171_v22  ;;  %v970_v50 = vsel %vm172_vm2, %v171_v22, %v291_v43 }
  0xd8   : >> { %191 = vrot.lane.b32.xlu0 %v183_v30, %s743_s2  ;;  %189 = vrot.lane.b32.xlu1 %v181_v31, %s743_s2  ;;  %v306_v49 = vadd.f32 %v295_v47, %v283_v18 }
  0xdc   : >> { %195 = vrot.lane.b32.xlu0 %v187_v36, %s743_s2  ;;  %193 = vrot.lane.b32.xlu1 %v185_v37, %s743_s2 }
  0xe0   : >> { %318 = vrot.lane.b32.xlu0 %v950_v40, %s743_s2  ;;  %316 = vrot.lane.b32.xlu1 %v954_v41, %s743_s2 }
  0xe4   : >> { %310 = vrot.lane.b32.xlu0 %v302_v45, %s743_s2  ;;  %308 = vrot.lane.b32.xlu1 %v300_v44, %s743_s2 }
  0xe8   : >> { %314 = vrot.lane.b32.xlu0 %v306_v49, %s743_s2  ;;  %312 = vrot.lane.b32.xlu1 %v304_v48, %s743_s2 }
  0xec   : >> { %322 = vrot.lane.b32.xlu0 %v970_v50, %s743_s2  ;;  %320 = vrot.lane.b32.xlu1 %v974_v51, %s743_s2 }
 0x142   : >> { %v200_v52 = vpop.permute.xlu0 %199  ;;  %v198_v53 = vpop.permute.xlu1 %197 }
 0x146   : >> { %v204_v54 = vpop.permute.xlu0 %203  ;;  %v202_v55 = vpop.permute.xlu1 %201 }
 0x14a   : >> { %v192_v56 = vpop.permute.xlu0 %191  ;;  %v190_v57 = vpop.permute.xlu1 %189 }
 0x14b   : >> { %v207_v58 = vsel %vm205_vm3, %v192_v56, %v200_v52  ;;  %v206_v59 = vsel %vm205_vm3, %v190_v57, %v198_v53  ;;  %v211_v5 = vsel %vm205_vm3, %v200_v52, %v192_v56  ;;  %v210_v6 = vsel %vm205_vm3, %v198_v53, %v190_v57 }
 0x14c   : >> { %v985_v60 = vadd.f32 %v207_v58, %v183_v30  ;;  %v987_v61 = vadd.f32 %v206_v59, %v181_v31  ;;  %v1010_v14 = vadd.f32 %v211_v5, %v906_v23  ;;  %v1013_v15 = vadd.f32 %v210_v6, %v910_v24 }
 0x14e   : >> { %224 = vrot.lane.b32.xlu0 %v985_v60, %s744_s3  ;;  %v196_v62 = vpop.permute.xlu0 %195  ;;  %222 = vrot.lane.b32.xlu1 %v987_v61, %s744_s3  ;;  %v194_v63 = vpop.permute.xlu1 %193 }
 0x14f   : >> { %v209_v0 = vsel %vm205_vm3, %v196_v62, %v204_v54  ;;  %v208_v2 = vsel %vm205_vm3, %v194_v63, %v202_v55  ;;  %v213_v16 = vsel %vm205_vm3, %v204_v54, %v196_v62  ;;  %v212_v17 = vsel %vm205_vm3, %v202_v55, %v194_v63 }
 0x150   : >> { %v997_v3 = vadd.f32 %v209_v0, %v187_v36  ;;  %v999_v4 = vadd.f32 %v208_v2, %v185_v37  ;;  %v1024_v20 = vadd.f32 %v213_v16, %v918_v26  ;;  %v1027_v21 = vadd.f32 %v212_v17, %v922_v27 }
 0x152   : >> { %228 = vrot.lane.b32.xlu0 %v997_v3, %s744_s3  ;;  %v319_v7 = vpop.permute.xlu0 %318  ;;  %226 = vrot.lane.b32.xlu1 %v999_v4, %s744_s3  ;;  %v317_v8 = vpop.permute.xlu1 %316 }
 0x156   : >> { %232 = vrot.lane.b32.xlu0 %v1010_v14, %s744_s3  ;;  %v311_v18 = vpop.permute.xlu0 %310  ;;  %230 = vrot.lane.b32.xlu1 %v1013_v15, %s744_s3  ;;  %v309_v19 = vpop.permute.xlu1 %308 }
 0x157   : >> { %v325_v22 = vsel %vm205_vm3, %v311_v18, %v319_v7  ;;  %v324_v23 = vsel %vm205_vm3, %v309_v19, %v317_v8  ;;  %v329_v34 = vsel %vm205_vm3, %v319_v7, %v311_v18  ;;  %v328_v35 = vsel %vm205_vm3, %v317_v8, %v309_v19 }
 0x158   : >> { %v1037_v28 = vadd.f32 %v325_v22, %v302_v45  ;;  %v1039_v26 = vadd.f32 %v324_v23, %v300_v44  ;;  %v1062_v36 = vadd.f32 %v329_v34, %v950_v40  ;;  %v1065_v37 = vadd.f32 %v328_v35, %v954_v41 }
 0x15a   : >> { %236 = vrot.lane.b32.xlu0 %v1024_v20, %s744_s3  ;;  %v315_v24 = vpop.permute.xlu0 %314  ;;  %234 = vrot.lane.b32.xlu1 %v1027_v21, %s744_s3  ;;  %v313_v25 = vpop.permute.xlu1 %312 }
 0x15e   : >> { %342 = vrot.lane.b32.xlu0 %v1037_v28, %s744_s3  ;;  %v323_v27 = vpop.permute.xlu0 %322  ;;  %340 = vrot.lane.b32.xlu1 %v1039_v26, %s744_s3  ;;  %v321_v29 = vpop.permute.xlu1 %320 }
 0x15f   : >> { %v327_v30 = vsel %vm205_vm3, %v315_v24, %v323_v27  ;;  %v326_v31 = vsel %vm205_vm3, %v313_v25, %v321_v29  ;;  %v331_v38 = vsel %vm205_vm3, %v323_v27, %v315_v24  ;;  %v330_v39 = vsel %vm205_vm3, %v321_v29, %v313_v25 }
 0x160   : >> { %v1049_v32 = vadd.f32 %v327_v30, %v306_v49  ;;  %v1051_v33 = vadd.f32 %v326_v31, %v304_v48  ;;  %v1076_v42 = vadd.f32 %v331_v38, %v970_v50  ;;  %v1079_v40 = vadd.f32 %v330_v39, %v974_v51 }
 0x162   : >> { %346 = vrot.lane.b32.xlu0 %v1049_v32, %s744_s3  ;;  %344 = vrot.lane.b32.xlu1 %v1051_v33, %s744_s3 }
 0x166   : >> { %350 = vrot.lane.b32.xlu0 %v1062_v36, %s744_s3  ;;  %348 = vrot.lane.b32.xlu1 %v1065_v37, %s744_s3 }
 0x16a   : >> { %354 = vrot.lane.b32.xlu0 %v1076_v42, %s744_s3  ;;  %352 = vrot.lane.b32.xlu1 %v1079_v40, %s744_s3 }
 0x1c0   : >> { %v225_v41 = vpop.permute.xlu0 %224  ;;  %v223_v43 = vpop.permute.xlu1 %222 }
 0x1c4   : >> { %v229_v44 = vpop.permute.xlu0 %228  ;;  %v227_v45 = vpop.permute.xlu1 %226 }
 0x1c8   : >> { %v233_v46 = vpop.permute.xlu0 %232  ;;  %v231_v47 = vpop.permute.xlu1 %230 }
 0x1c9   : >> { %v240_v48 = vsel %vm238_vm4, %v225_v41, %v233_v46  ;;  %v239_v49 = vsel %vm238_vm4, %v223_v43, %v231_v47  ;;  %v244_v58 = vsel %vm238_vm4, %v233_v46, %v225_v41  ;;  %v243_v59 = vsel %vm238_vm4, %v231_v47, %v223_v43 }
 0x1ca   : >> { %v249_v50 = vadd.f32 %v240_v48, %v985_v60  ;;  %v247_v51 = vadd.f32 %v239_v49, %v987_v61  ;;  %v250_v62 = vadd.f32 %v244_v58, %v1010_v14  ;;  %v248_v63 = vadd.f32 %v243_v59, %v1013_v15 }
 0x1cc   : >> { %257 = vrot.lane.b32.xlu0 %v249_v50, %s745_s4  ;;  %v237_v52 = vpop.permute.xlu0 %236  ;;  %255 = vrot.lane.b32.xlu1 %v247_v51, %s745_s4  ;;  %v235_v53 = vpop.permute.xlu1 %234 }
 0x1cd   : >> { %v242_v54 = vsel %vm238_vm4, %v229_v44, %v237_v52  ;;  %v241_v55 = vsel %vm238_vm4, %v227_v45, %v235_v53  ;;  %v246_v0 = vsel %vm238_vm4, %v237_v52, %v229_v44  ;;  %v245_v2 = vsel %vm238_vm4, %v235_v53, %v227_v45 }
 0x1ce   : >> { %v253_v56 = vadd.f32 %v242_v54, %v997_v3  ;;  %v251_v57 = vadd.f32 %v241_v55, %v999_v4  ;;  %v254_v5 = vadd.f32 %v246_v0, %v1024_v20  ;;  %v252_v6 = vadd.f32 %v245_v2, %v1027_v21 }
 0x1d0   : >> { %261 = vrot.lane.b32.xlu0 %v253_v56, %s745_s4  ;;  %v343_v60 = vpop.permute.xlu0 %342  ;;  %259 = vrot.lane.b32.xlu1 %v251_v57, %s745_s4  ;;  %v341_v61 = vpop.permute.xlu1 %340 }
 0x1d4   : >> { %265 = vrot.lane.b32.xlu0 %v250_v62, %s745_s4  ;;  %v347_v3 = vpop.permute.xlu0 %346  ;;  %263 = vrot.lane.b32.xlu1 %v248_v63, %s745_s4  ;;  %v345_v4 = vpop.permute.xlu1 %344 }
 0x1d8   : >> { %269 = vrot.lane.b32.xlu0 %v254_v5, %s745_s4  ;;  %v351_v7 = vpop.permute.xlu0 %350  ;;  %267 = vrot.lane.b32.xlu1 %v252_v6, %s745_s4  ;;  %v349_v8 = vpop.permute.xlu1 %348 }
 0x1d9   : >> { %v357_v14 = vsel %vm238_vm4, %v343_v60, %v351_v7  ;;  %v356_v15 = vsel %vm238_vm4, %v341_v61, %v349_v8  ;;  %v361_v24 = vsel %vm238_vm4, %v351_v7, %v343_v60  ;;  %v360_v25 = vsel %vm238_vm4, %v349_v8, %v341_v61 }
 0x1da   : >> { %v366_v16 = vadd.f32 %v357_v14, %v1037_v28  ;;  %v364_v17 = vadd.f32 %v356_v15, %v1039_v26  ;;  %v367_v28 = vadd.f32 %v361_v24, %v1062_v36  ;;  %v365_v26 = vadd.f32 %v360_v25, %v1065_v37 }
 0x1dc   : >> { %374 = vrot.lane.b32.xlu0 %v366_v16, %s745_s4  ;;  %v355_v18 = vpop.permute.xlu0 %354  ;;  %372 = vrot.lane.b32.xlu1 %v364_v17, %s745_s4  ;;  %v353_v19 = vpop.permute.xlu1 %352 }
 0x1dd   : >> { %v359_v20 = vsel %vm238_vm4, %v347_v3, %v355_v18  ;;  %v358_v21 = vsel %vm238_vm4, %v345_v4, %v353_v19  ;;  %v363_v27 = vsel %vm238_vm4, %v355_v18, %v347_v3  ;;  %v362_v29 = vsel %vm238_vm4, %v353_v19, %v345_v4 }
 0x1de   : >> { %v370_v22 = vadd.f32 %v359_v20, %v1049_v32  ;;  %v368_v23 = vadd.f32 %v358_v21, %v1051_v33  ;;  %v371_v30 = vadd.f32 %v363_v27, %v1076_v42  ;;  %v369_v31 = vadd.f32 %v362_v29, %v1079_v40 }
 0x1e0   : >> { %378 = vrot.lane.b32.xlu0 %v370_v22, %s745_s4  ;;  %376 = vrot.lane.b32.xlu1 %v368_v23, %s745_s4 }
 0x1e4   : >> { %382 = vrot.lane.b32.xlu0 %v367_v28, %s745_s4  ;;  %380 = vrot.lane.b32.xlu1 %v365_v26, %s745_s4 }
 0x1e8   : >> { %386 = vrot.lane.b32.xlu0 %v371_v30, %s745_s4  ;;  %384 = vrot.lane.b32.xlu1 %v369_v31, %s745_s4 }
 0x23e   : >> { %v258_v32 = vpop.permute.xlu0 %257  ;;  %v256_v33 = vpop.permute.xlu1 %255 }
 0x242   : >> { %v262_v34 = vpop.permute.xlu0 %261  ;;  %v260_v35 = vpop.permute.xlu1 %259 }
 0x246   : >> { %v266_v36 = vpop.permute.xlu0 %265  ;;  %v264_v37 = vpop.permute.xlu1 %263 }
 0x247   : >> { %v273_v42 = vsel %vm271_vm5, %v266_v36, %v258_v32  ;;  %v272_v40 = vsel %vm271_vm5, %v264_v37, %v256_v33 }
 0x248   : >> { %v277_v46 = vmul.f32 %v870_v9, %v273_v42  ;;  %v276_v47 = vmul.f32 %v870_v9, %v272_v40 }
 0x24a   : >> { %v270_v38 = vpop.permute.xlu0 %269  ;;  %v268_v39 = vpop.permute.xlu1 %267  ;;  %v397_v56 = vmul.f32 %v277_v46, %v277_v46  ;;  %v396_v57 = vmul.f32 %v276_v47, %v276_v47  ;;  %v409_v18 = vsub.f32 %v891_v13, %v277_v46  ;;  %v408_v20 = vsub.f32 %v885_v11, %v276_v47 }
 0x24b   : >> { %v275_v48 = vsel %vm271_vm5, %v270_v38, %v262_v34  ;;  %v274_v49 = vsel %vm271_vm5, %v268_v39, %v260_v35 }
 0x24c   : >> { %v279_v52 = vmul.f32 %v870_v9, %v275_v48  ;;  %v278_v53 = vmul.f32 %v870_v9, %v274_v49 }
 0x24e   : >> { %v375_v41 = vpop.permute.xlu0 %374  ;;  %v373_v43 = vpop.permute.xlu1 %372  ;;  %v399_v0 = vmul.f32 %v279_v52, %v279_v52  ;;  %v398_v2 = vmul.f32 %v278_v53, %v278_v53  ;;  %v411_v24 = vsub.f32 %v889_v12, %v279_v52  ;;  %v410_v28 = vsub.f32 %v883_v10, %v278_v53 }
 0x252   : >> { %v379_v44 = vpop.permute.xlu0 %378  ;;  %v377_v45 = vpop.permute.xlu1 %376 }
 0x256   : >> { %v383_v50 = vpop.permute.xlu0 %382  ;;  %v381_v51 = vpop.permute.xlu1 %380 }
 0x257   : >> { %v389_v54 = vsel %vm271_vm5, %v383_v50, %v375_v41  ;;  %v388_v55 = vsel %vm271_vm5, %v381_v51, %v373_v43 }
 0x258   : >> { %v393_v58 = vmul.f32 %v870_v9, %v389_v54  ;;  %v392_v59 = vmul.f32 %v870_v9, %v388_v55 }
 0x25a   : >> { %v401_v60 = vsub.f32 %v393_v58, %v397_v56  ;;  %v400_v61 = vsub.f32 %v392_v59, %v396_v57  ;;  %v387_v62 = vpop.permute.xlu0 %386  ;;  %v385_v63 = vpop.permute.xlu1 %384 }
 0x25b   : >> { %v391_v3 = vsel %vm271_vm5, %v387_v62, %v379_v44  ;;  %v390_v4 = vsel %vm271_vm5, %v385_v63, %v377_v45 }
 0x25c   : >> { %v405_v5 = vmax.f32 %v401_v60, 1e-10  ;;  %v404_v6 = vmax.f32 %v400_v61, 1e-10  ;;  %v395_v7 = vmul.f32 %v870_v9, %v391_v3  ;;  %v394_v8 = vmul.f32 %v870_v9, %v390_v4 }
 0x25e   : >> { %628 = vrsqrt.f32 %v405_v5  ;;  %v403_v14 = vsub.f32 %v395_v7, %v399_v0  ;;  %v402_v15 = vsub.f32 %v394_v8, %v398_v2 }
 0x25f   : >> { %630 = vrsqrt.f32 %v404_v6 }
 0x260   : >> { %v407_v16 = vmax.f32 %v403_v14, 1e-10  ;;  %v406_v17 = vmax.f32 %v402_v15, 1e-10 }
 0x262   : >> { %632 = vrsqrt.f32 %v407_v16 }
 0x263   : >> { %634 = vrsqrt.f32 %v406_v17 }
 0x26b   : >> { %v629_v19 = vpop.eup %628 }
 0x26c   : >> { %v631_v21 = vpop.eup %630  ;;  %v417_v22 = vmul.f32 %v629_v19, %v409_v18 }
 0x26d   : >> { %v416_v23 = vmul.f32 %v631_v21, %v408_v20 }
 0x26e   : >> { %vm421_vm6 = vcmp.ne.f32.partialorder %v417_v22, %v417_v22 }
 0x26f   : >> { %v633_v25 = vpop.eup %632  ;;  %v425_v26 = vsel %vm421_vm6, 0.0, %v417_v22  ;;  %vm420_vm7 = vcmp.ne.f32.partialorder %v416_v23, %v416_v23 }
 0x270   : >> { %v635_v27 = vpop.eup %634  ;;  %vm429_vm8 = vcmp.eq.f32.partialorder %v425_v26, inf  ;;  %v424_v29 = vsel %vm420_vm7, 0.0, %v416_v23  ;;  %v419_v13 = vmul.f32 %v633_v25, %v411_v24 }
 0x271   : >> { %v433_v30 = vsel %vm429_vm8, 3.4028235e+38, %v425_v26  ;;  %vm428_vm9 = vcmp.eq.f32.partialorder %v424_v29, inf  ;;  %v418_v11 = vmul.f32 %v635_v27, %v410_v28 }
 0x272   : >> { %vm437_vm10 = vcmp.eq.f32.partialorder %v433_v30, -inf  ;;  %v432_v31 = vsel %vm428_vm9, 3.4028235e+38, %v424_v29  ;;  %vm423_vm11 = vcmp.ne.f32.partialorder %v419_v13, %v419_v13 }
 0x273   : >> { %v441_v32 = vsel %vm437_vm10, -3.4028235e+38, %v433_v30  ;;  %vm436_vm12 = vcmp.eq.f32.partialorder %v432_v31, -inf  ;;  %v427_v12 = vsel %vm423_vm11, 0.0, %v419_v13  ;;  %vm422_vm13 = vcmp.ne.f32.partialorder %v418_v11, %v418_v11 }
 0x274   : >> { %446 = vst [vmem:[%s444_s5 + $0x8] sm:$0xff] %v441_v32  ;;  %v440_v10 = vsel %vm436_vm12, -3.4028235e+38, %v432_v31  ;;  %vm431_vm14 = vcmp.eq.f32.partialorder %v427_v12, inf  ;;  %v426_v33 = vsel %vm422_vm13, 0.0, %v418_v11 }
 0x275   : >> { %445 = vst [vmem:[%s444_s5] sm:$0xff] %v440_v10  ;;  %v435_v34 = vsel %vm431_vm14, 3.4028235e+38, %v427_v12  ;;  %vm430_vm15 = vcmp.eq.f32.partialorder %v426_v33, inf  ;;  %154 = sbr.rel (!%p152_p11) target bundleno = 81 (0x51), region = 78 }
 0x276   : >> { %vm439_vm0 = vcmp.eq.f32.partialorder %v435_v34, -inf  ;;  %v434_v35 = vsel %vm430_vm15, 3.4028235e+38, %v426_v33 }
 0x277   : >> { %v443_v36 = vsel %vm439_vm0, -3.4028235e+38, %v435_v34  ;;  %vm438_vm1 = vcmp.eq.f32.partialorder %v434_v35, -inf }
 0x278   : >> { %448 = vst [vmem:[%s444_s5 + $0x18] sm:$0xff] %v443_v36  ;;  %v442_v37 = vsel %vm438_vm1, -3.4028235e+38, %v434_v35 }
 0x279   : >> { %447 = vst [vmem:[%s444_s5 + $0x10] sm:$0xff] %v442_v37 }
 0x27a   : > { %677 = shalt.err (!%p674_p0)
}
 0x27b   : > { %s678_s30 = scalar_lea.hbm %s1189_s16, 8192  ;;  %s682_s27 = scalar_lea.hbm %s1236_s1, 16384 }
 0x27c   : > { %p679_p2 = scmp.ne.s32.totalorder %s1189_s16, %s678_s30  ;;  %p683_p3 = scmp.lt.s32.totalorder %s1189_s16, %s1236_s1 }
 0x27d   : > { %p684_p6 = scmp.lt.s32.totalorder %s682_s27, %s678_s30 }
 0x27e   : > { %p680_p9 = pnand %p679_p2, %p1245_p13 }
 0x27f   : > { %p685_p11 = por %p684_p6, %p683_p3 }
 0x280   : > { %p681_p1 = pneg %p680_p9 }
 0x282   : > { %p686_p12 = pnand %p685_p11, %p681_p1 }
 0x284   : > { %689 = shalt.err (!%p686_p12)
}
 0x285   : > { %s747_s2 = smov 128   ;;  %s748_s3 = smov 8  }
 0x286   : > { %565 = dma.vmem_to_hbm [thread:$0]  (%p1245_p13), %s1192_s20, 8192, %s1189_s16, %s450_s21, %s747_s2, %s747_s2, %s748_s3  }
 0x287 PF: > { %s478_s4 = sand.u32 1, %s720_s6   ;;  %p1246_p4 = scmp.ne.s32.totalorder %s1242_s19, 0 }
 0x288   : > { %p1247_p5 = scmp.ge.s32.totalorder %s732_s9, 2  ;;  %s479_s5 = scalar_lea.sflag [#allocation4], %s478_s4 }
 0x28a   : > { %p572_p7 = pnand %p1247_p5, %p1246_p4 }
 0x28c   : > { %p573_p8 = pneg %p572_p7 }
 0x28e   : > { %715 = dma.done.wait (%p573_p8), %s479_s5, 8192  }
 0x28f   : > { %717 = vsyncadd (%p573_p8), %s479_s5, 4294959104  ;;  %p14_p10 = scmp.ge.s32.totalorder %s784_s12, 4   ;;  %s1248_s6 = smov %s724_s7 }
 0x290   : > { %s1249_s7 = smov %s728_s8  ;;  %s1250_s8 = smov %s796_s15 }
 0x291   : > { %s1251_s9 = smov %s784_s12  ;;  %16 = sbr.rel (!%p14_p10) target bundleno = 5 (0x5), region = 89 }
 0x296   :  { %484 = vsyncpa [#allocation3], 1 }
 0x297   :  { %486 = vsyncpa [#allocation3 + $0x1], 1 }
 0x298   :  { %487 = vsyncpa [#allocation4], 1 }
 0x299   :  { %489 = vsyncpa [#allocation4 + $0x1], 1 }

</bundles_post_ra>
